<compile_context>
chip_gen: v7x
topology: tpu7x:2x2x1
jax: 0.10.0
libtpu: 0.0.40
codegen_flags: <defaults>
</compile_context>

<pallas_src>
import functools
import math

import jax
import jax.numpy as jnp
import numpy as np
from jax.experimental import pallas as pl
from jax.experimental.pallas import tpu as pltpu


_NEG_BIG = -1e30            # finite mask fill: exp underflows to 0, no -inf/NaN hazards
_LANES = 128
_VMEM_BLOCK_BUDGET = 40 << 20   # per-grid-step budget used when auto-picking batch_tile
_VMEM_LIMIT_CAP = 48 << 20      # leave headroom on v7x (64 MiB physical VMEM)


def gat_kernel(h_ref, bias_ref, wcat_ref, o_ref, wh_scr, f_scr, *,
               num_heads, out_features, alpha):
    """One grid step: `bt` graphs, all heads.

    h_ref    : (bt, n, in_f)    compute-dtype node features
    bias_ref : (bt, n, n)       bf16 additive mask (0 where adj!=0, -1e30 where adj==0)
    wcat_ref : (in_f, H*F+2H)   [W | W @ A_blockdiag] in compute dtype
    o_ref    : (bt, n, H*F)
    wh_scr   : (bt, n, H*F)     compute-dtype scratch (attention-matmul RHS)
    f_scr    : (bt, n, 2H)      f32 scratch (per-head a1/a2 scores)
    """
    bt, n, in_f = h_ref.shape
    hf = num_heads * out_features

    # --- One fused MXU matmul per tile gives Wh and both attention projections:
    #   proj[:, :hf]       = h @ W                     (Wh, all heads)
    #   proj[:, hf:hf+H]   = <Wh_h, a1_h>  per head    (source scores f1)
    #   proj[:, hf+H:]     = <Wh_h, a2_h>  per head    (target scores f2)
    proj = jnp.dot(h_ref[...].reshape(bt * n, in_f), wcat_ref[...],
                   preferred_element_type=jnp.float32)           # (bt*n, hf+2H) f32
    wh_scr[...] = proj[:, :hf].reshape(bt, n, hf).astype(wh_scr.dtype)
    f_scr[...] = proj[:, hf:].reshape(bt, n, 2 * num_heads)

    col = jax.lax.broadcasted_iota(jnp.int32, (1, hf), 1)        # head-column selector

    # TODO(synk): for very large n, tile the kv axis flash-style (online softmax
    # with m/l/acc scratch) so VMEM use is O(n*tkv) instead of O(n^2).
    def per_graph(b, carry):
        bias = bias_ref[b]                       # (n, n) bf16; promoted to f32 in the add
        whb = wh_scr[b]                          # (n, hf) compute dtype, shared by all heads
        fb = f_scr[b]                            # (n, 2H) f32
        f1 = fb[:, :num_heads]                   # (n, H) source scores
        f2t = fb[:, num_heads:].T                # (H, n) target scores: one small transpose

        acc = jnp.zeros((n, hf), jnp.float32)
        for hd in range(num_heads):              # H small & static; the acc dependency
            lo = hd * out_features               # chain keeps one (n,n) temp live at a time
            e = f1[:, hd:hd + 1] + f2t[hd:hd + 1, :]             # (n, n) raw logits
            e = jnp.maximum(e, alpha * e)                        # LeakyReLU(alpha)
            e = e + bias                                         # masked -> ~-1e30 (finite)
            m = jnp.max(e, axis=-1, keepdims=True)
            p = jnp.exp(e - m)
            s = jnp.sum(p, axis=-1, keepdims=True)
            attn = (p * pl.reciprocal(s, approx=True)).astype(whb.dtype)
            # TODO(synk): nn.Dropout(0.2) on attn — identity in eval-mode forward.
            # Full-width RHS: same MXU cycles as an F-wide slice, no lane slicing,
            # RHS reused across heads.
            outh = jnp.dot(attn, whb, preferred_element_type=jnp.float32)   # (n, hf)
            keep = (col >= lo) & (col < lo + out_features)
            acc = acc + jnp.where(keep, outh, 0.0)

        o_ref[b] = acc.astype(o_ref.dtype)       # lane-dense per-graph store
        return carry

    jax.lax.fori_loop(0, bt, per_graph, 0)


def _block_diag_a(a, num_heads, out_features):
    """(H, 2F) -> (H*F, 2H) block-diagonal so Wh_flat @ A gives every per-head
    <Wh, a1_h> / <Wh, a2_h> attention projection."""
    a1 = a[:, :out_features]                               # (H, F)
    a2 = a[:, out_features:]                               # (H, F)
    eye = jnp.eye(num_heads, dtype=a.dtype)                # (H, H)
    hf = num_heads * out_features
    blk1 = (a1[:, :, None] * eye[:, None, :]).reshape(hf, num_heads)
    blk2 = (a2[:, :, None] * eye[:, None, :]).reshape(hf, num_heads)
    return jnp.concatenate([blk1, blk2], axis=1)           # (H*F, 2H)


def _step_vmem_bytes(bt, n, in_f, hf, nh, cdt_bytes, out_bytes):
    """Generous per-grid-step VMEM estimate (double-buffered blocks + scratch + temps)."""
    blocks = 2 * (bt * n * in_f * cdt_bytes                # h (double-buffered)
                  + bt * n * n * 2                         # bf16 additive bias
                  + bt * n * hf * out_bytes)               # output
    blocks += 2 * in_f * (hf + 2 * nh) * cdt_bytes         # Wcat
    scratch = (bt * n * max(hf, _LANES) * cdt_bytes        # Wh scratch (lane-padded)
               + bt * n * _LANES * 4)                      # f scratch  (lane-padded)
    temps = (bt * n * max(hf + 2 * nh, _LANES) * 4         # proj value
             + 3 * n * max(n, _LANES) * 4                  # e / p / promoted bias
             + 2 * n * max(hf, _LANES) * 4)                # outh + acc
    return blocks + scratch + temps


def _choose_batch_tile(bs, n, in_f, hf, nh, cdt_bytes, out_bytes):
    target_rows = 256                      # fill >= one MXU pass of projection rows
    cap = max(1, target_rows // max(n, 1))
    if bs >= 2:
        cap = min(cap, bs // 2)            # keep >= 2 parallel grid steps (v7x: 2 TCs)
    cap = max(1, min(cap, bs))
    best = 1
    for cand in range(1, cap + 1):
        if bs % cand == 0 and _step_vmem_bytes(cand, n, in_f, hf, nh,
                                               cdt_bytes, out_bytes) <= _VMEM_BLOCK_BUDGET:
            best = cand
    return best


def multi_head_gat(h, adj, W, a, *, num_heads, out_features, alpha=0.2,
                   batch_tile=None, matmul_dtype=jnp.bfloat16):
    """Forward pass of MultiHeadGATLayer.

    h: (bs, n, in_features);  adj: (bs, n, n) binary adjacency
    W: (in_features, H*F) (nn.Linear weight stored transposed);  a: (H, 2*F)
    matmul_dtype: MXU operand dtype (bf16 default; pass jnp.float32 to validate).
    """
    bs, n, in_f = h.shape
    hf = num_heads * out_features
    assert W.shape == (in_f, hf) and a.shape == (num_heads, 2 * out_features)

    compute_dtype = jnp.dtype(matmul_dtype)
    out_dtype = h.dtype
    cdt_bytes = compute_dtype.itemsize
    out_bytes = jnp.dtype(out_dtype).itemsize

    if batch_tile is None:
        batch_tile = _choose_batch_tile(bs, n, in_f, hf, num_heads, cdt_bytes, out_bytes)
    assert bs % batch_tile == 0, "batch_tile must divide batch size"

    # Fold the per-head attention projections into the feature projection:
    #   Wcat = [ W | W @ A_blockdiag ]  -> one matmul yields Wh and all f1/f2.
    w32 = W.astype(jnp.float32)
    ablk = _block_diag_a(a.astype(jnp.float32), num_heads, out_features)
    wcat = jnp.concatenate([w32, w32 @ ablk], axis=1).astype(compute_dtype)

    h_c = h.astype(compute_dtype)          # halves the h DMA bytes on the bf16 path

    # Adjacency shipped as a bf16 additive bias (binary adjacency assumed): half
    # the DMA bytes of f32, no in-kernel compare/select, finite sentinel so rows
    # with zero neighbours give uniform attention instead of NaN (the torch
    # masked_fill(-inf) reference would produce NaN for such rows).
    bias = jnp.where(adj == 0, jnp.float32(_NEG_BIG),
                     jnp.float32(0.0)).astype(jnp.bfloat16)

    vmem_est = _step_vmem_bytes(batch_tile, n, in_f, hf, num_heads, cdt_bytes, out_bytes)
    vmem_limit = int(min(max(int(vmem_est * 1.25) + (4 << 20), 16 << 20), _VMEM_LIMIT_CAP))

    cost = pl.CostEstimate(
        flops=int(2 * bs * n * in_f * (hf + 2 * num_heads)
                  + 2 * bs * num_heads * n * n * hf),
        transcendentals=int(bs * num_heads * n * n),
        bytes_accessed=int(h_c.size * cdt_bytes + bias.size * 2
                           + wcat.size * cdt_bytes + bs * n * hf * out_bytes),
    )

    kernel = functools.partial(gat_kernel, num_heads=num_heads,
                               out_features=out_features, alpha=alpha)

    return pl.pallas_call(
        kernel,
        out_shape=jax.ShapeDtypeStruct((bs, n, hf), out_dtype),
        grid=(bs // batch_tile,),
        in_specs=[
            pl.BlockSpec((batch_tile, n, in_f), lambda i: (i, 0, 0)),      # h
            pl.BlockSpec((batch_tile, n, n), lambda i: (i, 0, 0)),         # additive mask
            pl.BlockSpec((in_f, hf + 2 * num_heads), lambda i: (0, 0)),    # Wcat
        ],
        out_specs=pl.BlockSpec((batch_tile, n, hf), lambda i: (i, 0, 0)),
        scratch_shapes=[
            pltpu.VMEM((batch_tile, n, hf), compute_dtype),                # Wh
            pltpu.VMEM((batch_tile, n, 2 * num_heads), jnp.float32),       # f1 | f2
        ],
        compiler_params=pltpu.CompilerParams(
            dimension_semantics=("parallel",),
            vmem_limit_bytes=vmem_limit),
        cost_estimate=cost,
    )(h_c, bias, wcat)


def gat_reference(h, adj, W, a, num_heads, out_features, alpha):
    """Pure-JAX reference mirroring the PyTorch forward (f32)."""
    bs, n, _ = h.shape
    Wh = (h @ W).reshape(bs, n, num_heads, out_features).transpose(0, 2, 1, 3)
    a1 = a[:, :out_features]
    a2 = a[:, out_features:]
    f1 = jnp.einsum('bhnf,hf->bhn', Wh, a1)
    f2 = jnp.einsum('bhnf,hf->bhn', Wh, a2)
    e = f1[..., :, None] + f2[..., None, :]
    e = jnp.where(e > 0, e, alpha * e)
    e = jnp.where(adj[:, None, :, :] == 0, -jnp.inf, e)
    attn = jax.nn.softmax(e, axis=-1)
    hp = jnp.einsum('bhij,bhjf->bhif', attn, Wh)
    return hp.transpose(0, 2, 1, 3).reshape(bs, n, num_heads * out_features)


def xavier_uniform(key, shape, fan_in, fan_out, gain):
    bound = gain * math.sqrt(6.0 / (fan_in + fan_out))
    return jax.random.uniform(key, shape, jnp.float32, minval=-bound, maxval=bound)


if __name__ == "__main__":
    bs, n = 2, 8
    in_features, out_features, num_heads = 16, 8, 4
    alpha = 0.2
    gain = 1.414

    key = jax.random.PRNGKey(0)
    k_h, k_adj, k_w, k_a = jax.random.split(key, 4)

    h = jax.random.normal(k_h, (bs, n, in_features), jnp.float32)

    # Binary adjacency with guaranteed self-loops (matches typical GAT usage).
    adj = (jax.random.uniform(k_adj, (bs, n, n)) < 0.5).astype(jnp.float32)
    adj = jnp.maximum(adj, jnp.eye(n, dtype=jnp.float32)[None, :, :])

    # Deterministic xavier_uniform init (gain=1.414), matching the torch module:
    #   W.weight : (H*F, in_features) -> stored transposed as (in_features, H*F)
    #   a        : (H, 2*F)
    hf = num_heads * out_features
    W = xavier_uniform(k_w, (in_features, hf), fan_in=in_features, fan_out=hf, gain=gain)
    a = xavier_uniform(k_a, (num_heads, 2 * out_features),
                       fan_in=2 * out_features, fan_out=num_heads, gain=gain)

    ref = gat_reference(h, adj, W, a, num_heads, out_features, alpha)
    ref_np = np.asarray(ref)
    ref_norm = np.linalg.norm(ref_np)

    # --- default path: bf16 MXU operands, auto batch_tile (2 parallel steps) --
    out_bf16 = multi_head_gat(h, adj, W, a, num_heads=num_heads,
                              out_features=out_features, alpha=alpha)
    out_bf16 = jax.block_until_ready(out_bf16)
    rel = np.linalg.norm(np.asarray(out_bf16) - ref_np) / ref_norm
    assert rel < 3e-2, f"bf16 path relative L2 error too large: {rel}"

    # --- f32 MXU operands (validation path) ----------------------------------
    out_f32 = multi_head_gat(h, adj, W, a, num_heads=num_heads,
                             out_features=out_features, alpha=alpha,
                             matmul_dtype=jnp.float32)
    out_f32 = jax.block_until_ready(out_f32)
    np.testing.assert_allclose(np.asarray(out_f32), ref_np, rtol=5e-3, atol=5e-3)

    # --- bf16 with both graphs folded into one grid step (exercise fori path) -
    out_bt2 = multi_head_gat(h, adj, W, a, num_heads=num_heads,
                             out_features=out_features, alpha=alpha,
                             batch_tile=2)
    out_bt2 = jax.block_until_ready(out_bt2)
    rel2 = np.linalg.norm(np.asarray(out_bt2) - ref_np) / ref_norm
    assert rel2 < 3e-2, f"bf16 batch_tile=2 path relative L2 error too large: {rel2}"

    print("KERNEL_OK")
</pallas_src>

<mosaic_0001>
module attributes {stable_mosaic.version = 11 : i64} {
  func.func @gat_kernel(%arg0: i32, %arg1: memref<1x8x16xbf16, #tpu.memory_space<vmem>>, %arg2: memref<1x8x8xbf16, #tpu.memory_space<vmem>>, %arg3: memref<16x40xbf16, #tpu.memory_space<vmem>>, %arg4: memref<1x8x32xf32, #tpu.memory_space<vmem>>, %arg5: memref<1x8x32xbf16, #tpu.memory_space<vmem>>, %arg6: memref<1x8x8xf32, #tpu.memory_space<vmem>>) attributes {dimension_semantics = [#tpu.dimension_semantics<parallel>], iteration_bounds = array<i64: 2>, scalar_prefetch = 0 : i64, scratch_operands = 2 : i64, tpu.core_type = #tpu.core_type<tc>, window_params = [{transform_indices = @transform_0, window_bounds = array<i64: 1, 8, 16>}, {transform_indices = @transform_1, window_bounds = array<i64: 1, 8, 8>}, {pipeline_mode = #tpu.pipeline_mode<synchronous>, transform_indices = @transform_2, window_bounds = array<i64: 16, 40>}, {transform_indices = @transform_3, window_bounds = array<i64: 1, 8, 32>}]} {
    %c0 = arith.constant 0 : index
    %c0_0 = arith.constant 0 : index
    %c0_1 = arith.constant 0 : index
    %0 = vector.load %arg1[%c0, %c0_0, %c0_1] : memref<1x8x16xbf16, #tpu.memory_space<vmem>>, vector<1x8x16xbf16>
    %1 = vector.shape_cast %0 : vector<1x8x16xbf16> to vector<8x16xbf16>
    %c0_2 = arith.constant 0 : index
    %c0_3 = arith.constant 0 : index
    %2 = vector.load %arg3[%c0_2, %c0_3] : memref<16x40xbf16, #tpu.memory_space<vmem>>, vector<16x40xbf16>
    %cst = arith.constant dense<0.000000e+00> : vector<8x40xf32>
    %3 = tpu.matmul %1, %2, %cst {dimension_numbers = #tpu.dot_dimension_numbers<[1], [0], [0], [1], [0, 0, 1, 1], [], []>} : vector<8x16xbf16>, vector<16x40xbf16>, vector<8x40xf32> -> vector<8x40xf32>
    %4 = vector.extract_strided_slice %3 {offsets = [0, 0], sizes = [8, 32], strides = [1, 1]} : vector<8x40xf32> to vector<8x32xf32>
    %5 = vector.shape_cast %4 : vector<8x32xf32> to vector<1x8x32xf32>
    %6 = arith.truncf %5 : vector<1x8x32xf32> to vector<1x8x32xbf16>
    %c0_4 = arith.constant 0 : index
    %c0_5 = arith.constant 0 : index
    %c0_6 = arith.constant 0 : index
    %7 = vector.load %arg5[%c0_4, %c0_5, %c0_6] : memref<1x8x32xbf16, #tpu.memory_space<vmem>>, vector<1x8x32xbf16>
    tpu.vector_store %arg5[%c0_4, %c0_5, %c0_6], %6 {strides = array<i32>} : memref<1x8x32xbf16, #tpu.memory_space<vmem>>, vector<1x8x32xbf16>,
    %8 = vector.extract_strided_slice %3 {offsets = [0, 32], sizes = [8, 8], strides = [1, 1]} : vector<8x40xf32> to vector<8x8xf32>
    %9 = vector.shape_cast %8 : vector<8x8xf32> to vector<1x8x8xf32>
    %c0_7 = arith.constant 0 : index
    %c0_8 = arith.constant 0 : index
    %c0_9 = arith.constant 0 : index
    %10 = vector.load %arg6[%c0_7, %c0_8, %c0_9] : memref<1x8x8xf32, #tpu.memory_space<vmem>>, vector<1x8x8xf32>
    tpu.vector_store %arg6[%c0_7, %c0_8, %c0_9], %9 {strides = array<i32>} : memref<1x8x8xf32, #tpu.memory_space<vmem>>, vector<1x8x8xf32>,
    %11 = tpu.iota {dimensions = array<i32: 1>} : vector<1x32xi32>
    %c0_i32 = arith.constant 0 : i32
    %12 = arith.index_cast %c0_i32 : i32 to index
    %c0_10 = arith.constant 0 : index
    %c0_11 = arith.constant 0 : index
    %13 = vector.load %arg2[%12, %c0_10, %c0_11] : memref<1x8x8xbf16, #tpu.memory_space<vmem>>, vector<1x8x8xbf16>
    %14 = vector.shape_cast %13 : vector<1x8x8xbf16> to vector<8x8xbf16>
    %15 = arith.index_cast %c0_i32 : i32 to index
    %c0_12 = arith.constant 0 : index
    %c0_13 = arith.constant 0 : index
    %16 = vector.load %arg5[%15, %c0_12, %c0_13] : memref<1x8x32xbf16, #tpu.memory_space<vmem>>, vector<1x8x32xbf16>
    %17 = vector.shape_cast %16 : vector<1x8x32xbf16> to vector<8x32xbf16>
    %18 = arith.index_cast %c0_i32 : i32 to index
    %c0_14 = arith.constant 0 : index
    %c0_15 = arith.constant 0 : index
    %19 = vector.load %arg6[%18, %c0_14, %c0_15] : memref<1x8x8xf32, #tpu.memory_space<vmem>>, vector<1x8x8xf32>
    %20 = vector.shape_cast %19 : vector<1x8x8xf32> to vector<8x8xf32>
    %21 = vector.extract_strided_slice %20 {offsets = [0, 0], sizes = [8, 4], strides = [1, 1]} : vector<8x8xf32> to vector<8x4xf32>
    %22 = vector.extract_strided_slice %20 {offsets = [0, 4], sizes = [8, 4], strides = [1, 1]} : vector<8x8xf32> to vector<8x4xf32>
    %23 = tpu.transpose %22, [1, 0] : vector<8x4xf32> -> vector<4x8xf32>
    %cst_16 = arith.constant 0.000000e+00 : f32
    %24 = vector.broadcast %cst_16 : f32 to vector<8x32xf32>
    %25 = vector.extract_strided_slice %21 {offsets = [0, 0], sizes = [8, 1], strides = [1, 1]} : vector<8x4xf32> to vector<8x1xf32>
    %26 = vector.extract_strided_slice %23 {offsets = [0, 0], sizes = [1, 8], strides = [1, 1]} : vector<4x8xf32> to vector<1x8xf32>
    %27 = vector.broadcast %25 : vector<8x1xf32> to vector<8x8xf32>
    %28 = vector.broadcast %26 : vector<1x8xf32> to vector<8x8xf32>
    %29 = arith.addf %27, %28 : vector<8x8xf32>
    %cst_17 = arith.constant 2.000000e-01 : f32
    %30 = vector.broadcast %cst_17 : f32 to vector<8x8xf32>
    %31 = arith.mulf %30, %29 : vector<8x8xf32>
    %32 = arith.maximumf %29, %31 : vector<8x8xf32>
    %33 = arith.extf %14 : vector<8x8xbf16> to vector<8x8xf32>
    %34 = arith.addf %32, %33 : vector<8x8xf32>
    %cst_18 = arith.constant dense<0xFF800000> : vector<8xf32>
    %35 = vector.multi_reduction <maximumf>, %34, %cst_18 [1] : vector<8x8xf32> to vector<8xf32>
    %36 = vector.shape_cast %35 : vector<8xf32> to vector<8x1xf32>
    %37 = vector.broadcast %36 : vector<8x1xf32> to vector<8x8xf32>
    %38 = arith.subf %34, %37 : vector<8x8xf32>
    %39 = math.exp %38 : vector<8x8xf32>
    %cst_19 = arith.constant dense<0.000000e+00> : vector<8xf32>
    %40 = vector.multi_reduction <add>, %39, %cst_19 [1] : vector<8x8xf32> to vector<8xf32>
    %41 = vector.shape_cast %40 : vector<8xf32> to vector<8x1xf32>
    %42 = tpu.reciprocal %41 {approx = true} : vector<8x1xf32> -> vector<8x1xf32>
    %43 = vector.broadcast %42 : vector<8x1xf32> to vector<8x8xf32>
    %44 = arith.mulf %39, %43 : vector<8x8xf32>
    %45 = arith.truncf %44 : vector<8x8xf32> to vector<8x8xbf16>
    %cst_20 = arith.constant dense<0.000000e+00> : vector<8x32xf32>
    %46 = tpu.matmul %45, %17, %cst_20 {dimension_numbers = #tpu.dot_dimension_numbers<[1], [0], [0], [1], [0, 0, 1, 1], [], []>} : vector<8x8xbf16>, vector<8x32xbf16>, vector<8x32xf32> -> vector<8x32xf32>
    %c0_i32_21 = arith.constant 0 : i32
    %47 = vector.broadcast %c0_i32_21 : i32 to vector<1x32xi32>
    %48 = arith.cmpi sge, %11, %47 : vector<1x32xi32>
    %c8_i32 = arith.constant 8 : i32
    %49 = vector.broadcast %c8_i32 : i32 to vector<1x32xi32>
    %50 = arith.cmpi slt, %11, %49 : vector<1x32xi32>
    %51 = arith.andi %48, %50 : vector<1x32xi1>
    %cst_22 = arith.constant 0.000000e+00 : f32
    %52 = vector.shape_cast %51 : vector<1x32xi1> to vector<1x32xi1>
    %53 = vector.broadcast %52 : vector<1x32xi1> to vector<8x32xi1>
    %54 = vector.broadcast %cst_22 : f32 to vector<8x32xf32>
    %55 = arith.select %53, %46, %54 : vector<8x32xi1>, vector<8x32xf32>
    %56 = arith.addf %24, %55 : vector<8x32xf32>
    %57 = vector.extract_strided_slice %21 {offsets = [0, 1], sizes = [8, 1], strides = [1, 1]} : vector<8x4xf32> to vector<8x1xf32>
    %58 = vector.extract_strided_slice %23 {offsets = [1, 0], sizes = [1, 8], strides = [1, 1]} : vector<4x8xf32> to vector<1x8xf32>
    %59 = vector.broadcast %57 : vector<8x1xf32> to vector<8x8xf32>
    %60 = vector.broadcast %58 : vector<1x8xf32> to vector<8x8xf32>
    %61 = arith.addf %59, %60 : vector<8x8xf32>
    %cst_23 = arith.constant 2.000000e-01 : f32
    %62 = vector.broadcast %cst_23 : f32 to vector<8x8xf32>
    %63 = arith.mulf %62, %61 : vector<8x8xf32>
    %64 = arith.maximumf %61, %63 : vector<8x8xf32>
    %65 = arith.extf %14 : vector<8x8xbf16> to vector<8x8xf32>
    %66 = arith.addf %64, %65 : vector<8x8xf32>
    %cst_24 = arith.constant dense<0xFF800000> : vector<8xf32>
    %67 = vector.multi_reduction <maximumf>, %66, %cst_24 [1] : vector<8x8xf32> to vector<8xf32>
    %68 = vector.shape_cast %67 : vector<8xf32> to vector<8x1xf32>
    %69 = vector.broadcast %68 : vector<8x1xf32> to vector<8x8xf32>
    %70 = arith.subf %66, %69 : vector<8x8xf32>
    %71 = math.exp %70 : vector<8x8xf32>
    %cst_25 = arith.constant dense<0.000000e+00> : vector<8xf32>
    %72 = vector.multi_reduction <add>, %71, %cst_25 [1] : vector<8x8xf32> to vector<8xf32>
    %73 = vector.shape_cast %72 : vector<8xf32> to vector<8x1xf32>
    %74 = tpu.reciprocal %73 {approx = true} : vector<8x1xf32> -> vector<8x1xf32>
    %75 = vector.broadcast %74 : vector<8x1xf32> to vector<8x8xf32>
    %76 = arith.mulf %71, %75 : vector<8x8xf32>
    %77 = arith.truncf %76 : vector<8x8xf32> to vector<8x8xbf16>
    %cst_26 = arith.constant dense<0.000000e+00> : vector<8x32xf32>
    %78 = tpu.matmul %77, %17, %cst_26 {dimension_numbers = #tpu.dot_dimension_numbers<[1], [0], [0], [1], [0, 0, 1, 1], [], []>} : vector<8x8xbf16>, vector<8x32xbf16>, vector<8x32xf32> -> vector<8x32xf32>
    %c8_i32_27 = arith.constant 8 : i32
    %79 = vector.broadcast %c8_i32_27 : i32 to vector<1x32xi32>
    %80 = arith.cmpi sge, %11, %79 : vector<1x32xi32>
    %c16_i32 = arith.constant 16 : i32
    %81 = vector.broadcast %c16_i32 : i32 to vector<1x32xi32>
    %82 = arith.cmpi slt, %11, %81 : vector<1x32xi32>
    %83 = arith.andi %80, %82 : vector<1x32xi1>
    %cst_28 = arith.constant 0.000000e+00 : f32
    %84 = vector.shape_cast %83 : vector<1x32xi1> to vector<1x32xi1>
    %85 = vector.broadcast %84 : vector<1x32xi1> to vector<8x32xi1>
    %86 = vector.broadcast %cst_28 : f32 to vector<8x32xf32>
    %87 = arith.select %85, %78, %86 : vector<8x32xi1>, vector<8x32xf32>
    %88 = arith.addf %56, %87 : vector<8x32xf32>
    %89 = vector.extract_strided_slice %21 {offsets = [0, 2], sizes = [8, 1], strides = [1, 1]} : vector<8x4xf32> to vector<8x1xf32>
    %90 = vector.extract_strided_slice %23 {offsets = [2, 0], sizes = [1, 8], strides = [1, 1]} : vector<4x8xf32> to vector<1x8xf32>
    %91 = vector.broadcast %89 : vector<8x1xf32> to vector<8x8xf32>
    %92 = vector.broadcast %90 : vector<1x8xf32> to vector<8x8xf32>
    %93 = arith.addf %91, %92 : vector<8x8xf32>
    %cst_29 = arith.constant 2.000000e-01 : f32
    %94 = vector.broadcast %cst_29 : f32 to vector<8x8xf32>
    %95 = arith.mulf %94, %93 : vector<8x8xf32>
    %96 = arith.maximumf %93, %95 : vector<8x8xf32>
    %97 = arith.extf %14 : vector<8x8xbf16> to vector<8x8xf32>
    %98 = arith.addf %96, %97 : vector<8x8xf32>
    %cst_30 = arith.constant dense<0xFF800000> : vector<8xf32>
    %99 = vector.multi_reduction <maximumf>, %98, %cst_30 [1] : vector<8x8xf32> to vector<8xf32>
    %100 = vector.shape_cast %99 : vector<8xf32> to vector<8x1xf32>
    %101 = vector.broadcast %100 : vector<8x1xf32> to vector<8x8xf32>
    %102 = arith.subf %98, %101 : vector<8x8xf32>
    %103 = math.exp %102 : vector<8x8xf32>
    %cst_31 = arith.constant dense<0.000000e+00> : vector<8xf32>
    %104 = vector.multi_reduction <add>, %103, %cst_31 [1] : vector<8x8xf32> to vector<8xf32>
    %105 = vector.shape_cast %104 : vector<8xf32> to vector<8x1xf32>
    %106 = tpu.reciprocal %105 {approx = true} : vector<8x1xf32> -> vector<8x1xf32>
    %107 = vector.broadcast %106 : vector<8x1xf32> to vector<8x8xf32>
    %108 = arith.mulf %103, %107 : vector<8x8xf32>
    %109 = arith.truncf %108 : vector<8x8xf32> to vector<8x8xbf16>
    %cst_32 = arith.constant dense<0.000000e+00> : vector<8x32xf32>
    %110 = tpu.matmul %109, %17, %cst_32 {dimension_numbers = #tpu.dot_dimension_numbers<[1], [0], [0], [1], [0, 0, 1, 1], [], []>} : vector<8x8xbf16>, vector<8x32xbf16>, vector<8x32xf32> -> vector<8x32xf32>
    %c16_i32_33 = arith.constant 16 : i32
    %111 = vector.broadcast %c16_i32_33 : i32 to vector<1x32xi32>
    %112 = arith.cmpi sge, %11, %111 : vector<1x32xi32>
    %c24_i32 = arith.constant 24 : i32
    %113 = vector.broadcast %c24_i32 : i32 to vector<1x32xi32>
    %114 = arith.cmpi slt, %11, %113 : vector<1x32xi32>
    %115 = arith.andi %112, %114 : vector<1x32xi1>
    %cst_34 = arith.constant 0.000000e+00 : f32
    %116 = vector.shape_cast %115 : vector<1x32xi1> to vector<1x32xi1>
    %117 = vector.broadcast %116 : vector<1x32xi1> to vector<8x32xi1>
    %118 = vector.broadcast %cst_34 : f32 to vector<8x32xf32>
    %119 = arith.select %117, %110, %118 : vector<8x32xi1>, vector<8x32xf32>
    %120 = arith.addf %88, %119 : vector<8x32xf32>
    %121 = vector.extract_strided_slice %21 {offsets = [0, 3], sizes = [8, 1], strides = [1, 1]} : vector<8x4xf32> to vector<8x1xf32>
    %122 = vector.extract_strided_slice %23 {offsets = [3, 0], sizes = [1, 8], strides = [1, 1]} : vector<4x8xf32> to vector<1x8xf32>
    %123 = vector.broadcast %121 : vector<8x1xf32> to vector<8x8xf32>
    %124 = vector.broadcast %122 : vector<1x8xf32> to vector<8x8xf32>
    %125 = arith.addf %123, %124 : vector<8x8xf32>
    %cst_35 = arith.constant 2.000000e-01 : f32
    %126 = vector.broadcast %cst_35 : f32 to vector<8x8xf32>
    %127 = arith.mulf %126, %125 : vector<8x8xf32>
    %128 = arith.maximumf %125, %127 : vector<8x8xf32>
    %129 = arith.extf %14 : vector<8x8xbf16> to vector<8x8xf32>
    %130 = arith.addf %128, %129 : vector<8x8xf32>
    %cst_36 = arith.constant dense<0xFF800000> : vector<8xf32>
    %131 = vector.multi_reduction <maximumf>, %130, %cst_36 [1] : vector<8x8xf32> to vector<8xf32>
    %132 = vector.shape_cast %131 : vector<8xf32> to vector<8x1xf32>
    %133 = vector.broadcast %132 : vector<8x1xf32> to vector<8x8xf32>
    %134 = arith.subf %130, %133 : vector<8x8xf32>
    %135 = math.exp %134 : vector<8x8xf32>
    %cst_37 = arith.constant dense<0.000000e+00> : vector<8xf32>
    %136 = vector.multi_reduction <add>, %135, %cst_37 [1] : vector<8x8xf32> to vector<8xf32>
    %137 = vector.shape_cast %136 : vector<8xf32> to vector<8x1xf32>
    %138 = tpu.reciprocal %137 {approx = true} : vector<8x1xf32> -> vector<8x1xf32>
    %139 = vector.broadcast %138 : vector<8x1xf32> to vector<8x8xf32>
    %140 = arith.mulf %135, %139 : vector<8x8xf32>
    %141 = arith.truncf %140 : vector<8x8xf32> to vector<8x8xbf16>
    %cst_38 = arith.constant dense<0.000000e+00> : vector<8x32xf32>
    %142 = tpu.matmul %141, %17, %cst_38 {dimension_numbers = #tpu.dot_dimension_numbers<[1], [0], [0], [1], [0, 0, 1, 1], [], []>} : vector<8x8xbf16>, vector<8x32xbf16>, vector<8x32xf32> -> vector<8x32xf32>
    %c24_i32_39 = arith.constant 24 : i32
    %143 = vector.broadcast %c24_i32_39 : i32 to vector<1x32xi32>
    %144 = arith.cmpi sge, %11, %143 : vector<1x32xi32>
    %c32_i32 = arith.constant 32 : i32
    %145 = vector.broadcast %c32_i32 : i32 to vector<1x32xi32>
    %146 = arith.cmpi slt, %11, %145 : vector<1x32xi32>
    %147 = arith.andi %144, %146 : vector<1x32xi1>
    %cst_40 = arith.constant 0.000000e+00 : f32
    %148 = vector.shape_cast %147 : vector<1x32xi1> to vector<1x32xi1>
    %149 = vector.broadcast %148 : vector<1x32xi1> to vector<8x32xi1>
    %150 = vector.broadcast %cst_40 : f32 to vector<8x32xf32>
    %151 = arith.select %149, %142, %150 : vector<8x32xi1>, vector<8x32xf32>
    %152 = arith.addf %120, %151 : vector<8x32xf32>
    %153 = arith.index_cast %c0_i32 : i32 to index
    %c0_41 = arith.constant 0 : index
    %c0_42 = arith.constant 0 : index
    %154 = vector.load %arg4[%153, %c0_41, %c0_42] : memref<1x8x32xf32, #tpu.memory_space<vmem>>, vector<1x8x32xf32>
    %155 = vector.shape_cast %154 : vector<1x8x32xf32> to vector<8x32xf32>
    %156 = vector.shape_cast %152 : vector<8x32xf32> to vector<1x8x32xf32>
    tpu.vector_store %arg4[%153, %c0_41, %c0_42], %156 {strides = array<i32>} : memref<1x8x32xf32, #tpu.memory_space<vmem>>, vector<1x8x32xf32>,
    %c1_i32 = arith.constant 1 : i32
    return
  }
  func.func @transform_0(%arg0: i32) -> (i32, i32, i32) {
    %c0_i32 = arith.constant 0 : i32
    %c0_i32_0 = arith.constant 0 : i32
    %c0_i32_1 = arith.constant 0 : i32
    return %arg0, %c0_i32, %c0_i32_0 : i32, i32, i32
  }
  func.func @transform_1(%arg0: i32) -> (i32, i32, i32) {
    %c0_i32 = arith.constant 0 : i32
    %c0_i32_0 = arith.constant 0 : i32
    %c0_i32_1 = arith.constant 0 : i32
    return %arg0, %c0_i32, %c0_i32_0 : i32, i32, i32
  }
  func.func @transform_2(%arg0: i32) -> (i32, i32) {
    %c0_i32 = arith.constant 0 : i32
    %c0_i32_0 = arith.constant 0 : i32
    %c0_i32_1 = arith.constant 0 : i32
    return %c0_i32, %c0_i32_0 : i32, i32
  }
  func.func @transform_3(%arg0: i32) -> (i32, i32, i32) {
    %c0_i32 = arith.constant 0 : i32
    %c0_i32_0 = arith.constant 0 : i32
    %c0_i32_1 = arith.constant 0 : i32
    return %arg0, %c0_i32, %c0_i32_0 : i32, i32, i32
  }
}

</mosaic_0001>

<bundles_post_ra>
// kernel: tpu_custom_call.1
= control target key start
LH: loop header
LB: loop body
LE: loop exit
PB: predicated region body
PF: predicated region fallthrough
CT: control target
= control target key end

     0   :  { %8 = vsyncpa [#allocation5], 0  ;;  %s1385_s0 = inlined_call_operand.hbm [shape: bf16[2,8,16], index: 0, kind: input, shape index: {}]   ;;  %s1386_s1 = inlined_call_operand.hbm [shape: bf16[2,8,8], index: 1, kind: input, shape index: {}]   ;;  %s1387_s2 = inlined_call_operand.hbm [shape: bf16[16,40], index: 2, kind: input, shape index: {}]   ;;  %s1388_s3 = inlined_call_operand.hbm [shape: f32[2,8,32], index: 3, kind: output, shape index: {}]  }
   0x1   :  { %10 = vsyncpa [#allocation5 + $0x1], 0 }
   0x2   :  { %11 = vsyncpa [#allocation8], 0 }
   0x3   :  { %13 = vsyncpa [#allocation8 + $0x1], 0 }
   0x4   :  { %14 = vsyncpa [#allocation6], 0 }
   0x5   :  { %16 = vsyncpa [#allocation6 + $0x1], 0  ;;  %s1115_s12 = smov 0   ;;  %s1117_s13 = smov 0  }
   0x6   :  { %s1119_s14 = smov 0   ;;  %s1121_s15 = smov 0  }
   0x7 LB: > { %s1136_s16 = sadd.s32 4294967295, %s1079_s15   ;;  %s760_s17 = sadd.s32 4294967294, %s1079_s15   ;;  %s1079_s15 = sphi %s1121_s15, %s1410_s15   ;;  %s1075_s14 = sphi %s1119_s14, %s1409_s14   ;;  %s1071_s13 = sphi %s1117_s13, %s1408_s13   ;;  %s1067_s12 = sphi %s1115_s12, %s1407_s12  }
   0x8   : > { %p42_p0 = scmp.ne.s32.totalorder %s1071_s13, %s1067_s12  ;;  %p1389_p1 = scmp.eq.s32.totalorder %s1136_s16, 0 }
   0x9   : > { %p119_p3 = scmp.eq.s32.totalorder %s760_s17, 1  ;;  %p761_p5 = scmp.ge.s32.totalorder %s1079_s15, 1 }
   0xa   : > { %p1145_p4 = por %p1389_p1, %p42_p0  ;;  %p126_p7 = scmp.lt.s32.totalorder %s1079_s15, 3 }
   0xb   : > { %p1150_p6 = por %p119_p3, %p42_p0  ;;  %s1081_s21 = smov [#allocation9]  }
   0xc   : > { %s1393_s18 = scalar_select %p1145_p4, 1, 0 }
   0xd   : > { %s1394_s19 = scalar_select %p1150_p6, 1, 0 }
   0xe   : > { %p1155_p8 = pnand %p761_p5, %p126_p7  ;;  %s138_s22 = sshll.u32 %s1081_s21, 4  ;;  %s1159_s22 = int_to_ptr.vmem [resolvable:$true] %s138_s22 }
   0xf   : > { %s1171_s24 = sadd.s32 1, %s1079_s15   ;;  %s29_s25 = sadd.s32 1, %s1075_s14 }
  0x10   : > { %s1395_s20 = scalar_select %p1155_p8, 1, 0 }
  0x11   : > { %p833_p9 = pneg %p1155_p8  ;;  %s26_s26 = ssub.s32 %s1079_s15, %s1171_s24 }
  0x12   : > { %s917_s29 = scalar_lea.hbm %s1387_s2, 128 }
  0x13   : > { %p1166_p11 = pnand %p833_p9, %p1389_p1  ;;  %p918_p12 = scmp.ne.s32.totalorder %s1387_s2, %s917_s29 }
  0x14   : > { %p924_p5 = scmp.lt.u32.totalorder %s917_s29, %s1387_s2 }
  0x15   : > { %p919_p13 = pneg %p1166_p11 }
  0x17   : > { %p920_p0 = pnand %p919_p13, %p918_p12 }
  0x19   : > { %p921_p3 = pneg %p920_p0 }
  0x1b   : > { %p926_p7 = pnand %p924_p5, %p921_p3 }
  0x1d   : > { %929 = shalt.err (!%p926_p7)
}
  0x1e   : > { %s930_s7 = scalar_lea.vmem %s1159_s22, 128  ;;  %p938_p2 = scmp.lt.s32.totalorder %s1159_s22, %s1159_s22 }
  0x1f   : > { %p931_p9 = scmp.ne.s32.totalorder %s1159_s22, %s930_s7  ;;  %p939_p6 = scmp.lt.s32.totalorder %s930_s7, %s930_s7 }
  0x21   : > { %p933_p10 = pnand %p931_p9, %p919_p13  ;;  %p940_p4 = por %p939_p6, %p938_p2 }
  0x23   : > { %p934_p1 = pneg %p933_p10 }
  0x25   : > { %p941_p8 = pnand %p940_p4, %p934_p1 }
  0x27   : > { %944 = shalt.err (!%p941_p8)
}
  0x28   : > { %s1082_s8 = smov 64   ;;  %s1083_s9 = smov 4  }
  0x29   : > { %836 = dma.hbm_to_vmem [thread:$0]  (!%p1166_p11), %s1387_s2, 128, %s1159_s22, [#allocation8], %s1082_s8, %s1082_s8, %s1083_s9  }
  0x2a   : > { %p27_p2 = scmp.eq.s32.totalorder %s26_s26, 0  ;;  %p36_p1 = scmp.ne.s32.totalorder %s1075_s14, %s1071_s13 }
  0x2b   : > { %p37_p4 = scmp.eq.s32.totalorder %s1079_s15, 0  ;;  %p849_p6 = scmp.lt.s32.totalorder %s1079_s15, 2 }
  0x2c   : > { %s1202_s17 = scalar_select %p27_p2, %s1075_s14, %s29_s25  }
  0x2d   : > { %p38_p8 = por %p37_p4, %p36_p1  ;;  %p1397_p10 = scmp.eq.s32.totalorder %s1136_s16, 1 }
  0x2e   : > { %s152_s27 = sand.u32 1, %s1075_s14   ;;  %s765_s28 = sshll.u32 %s1079_s15, 6 }
  0x2f   : > { %p1206_p12 = por %p1397_p10, %p36_p1  ;;  %s1212_s29 = sshll.u32 %s152_s27, 2 }
  0x30   : > { %s1217_s22 = scalar_lea.hbm %s1385_s0, %s765_s28  ;;  %s156_s25 = scalar_lea.vmem [#allocation4], %s1212_s29 }
  0x31   : > { %s1398_s21 = scalar_select %p1206_p12, 1, 0 }
  0x32   : > { %s163_s26 = sshll.u32 %s156_s25, 4  ;;  %p1220_p11 = pnand %p849_p6, %p38_p8  ;;  %s1224_s26 = int_to_ptr.vmem [resolvable:$true] %s163_s26 }
  0x33   : > { %s1229_s7 = scalar_lea.hbm %s1386_s1, %s765_s28  ;;  %s153_s8 = scalar_lea.sflag [#allocation5], %s152_s27 }
  0x34   : > { %s945_s9 = scalar_lea.hbm %s1217_s22, 64  ;;  %p947_p0 = pneg %p1220_p11 }
  0x35   : > { %p946_p13 = scmp.ne.s32.totalorder %s1217_s22, %s945_s9  ;;  %s950_s23 = scalar_lea.hbm %s1385_s0, 128 }
  0x36   : > { %p951_p7 = scmp.lt.u32.totalorder %s1217_s22, %s1385_s0  ;;  %p952_p9 = scmp.lt.u32.totalorder %s950_s23, %s945_s9 }
  0x37   : > { %p948_p3 = pnand %p947_p0, %p946_p13  ;;  %p954_p1 = scmp.lt.u32.totalorder %s945_s9, %s1217_s22 }
  0x38   : > { %p953_p2 = por %p952_p9, %p951_p7 }
  0x39   : > { %p949_p5 = pneg %p948_p3 }
  0x3a   : > { %p955_p4 = por %p954_p1, %p953_p2 }
  0x3c   : > { %p956_p6 = pnand %p955_p4, %p949_p5 }
  0x3e   : > { %959 = shalt.err (!%p956_p6)
}
  0x3f   : > { %s960_s27 = scalar_lea.vmem %s1224_s26, 64  ;;  %s1084_s28 = smov [#allocation4]  }
  0x40   : > { %p961_p8 = scmp.ne.s32.totalorder %s1224_s26, %s960_s27  ;;  %s965_s5 = sshll.u32 %s1084_s28, 4  ;;  %s966_s5 = int_to_ptr.vmem [resolvable:$false] %s965_s5 }
  0x41   : > { %s967_s6 = scalar_lea.vmem %s966_s5, 128  ;;  %p968_p3 = scmp.lt.s32.totalorder %s1224_s26, %s966_s5 }
  0x42   : > { %p963_p10 = pnand %p961_p8, %p947_p0  ;;  %p969_p7 = scmp.lt.s32.totalorder %s967_s6, %s960_s27 }
  0x44   : > { %p964_p13 = pneg %p963_p10  ;;  %p970_p9 = por %p969_p7, %p968_p3 }
  0x46   : > { %p971_p2 = pnand %p970_p9, %p964_p13 }
  0x48   : > { %974 = shalt.err (!%p971_p2)
}
  0x49   : > { %840 = dma.hbm_to_vmem [thread:$0]  (!%p1220_p11), %s1217_s22, 64, %s1224_s26, %s153_s8  }
  0x4a   : > { %s170_s9 = sand.u32 1, %s1079_s15   ;;  %s174_s10 = scalar_lea.vmem [#allocation7], %s1212_s29 }
  0x4b   : > { %s181_s11 = sshll.u32 %s174_s10, 4  ;;  %s171_s23 = scalar_lea.sflag [#allocation8], %s170_s9  ;;  %s182_s11 = int_to_ptr.vmem [resolvable:$true] %s181_s11 }
  0x4c   : > { %s975_s30 = scalar_lea.hbm %s1229_s7, 64  ;;  %s980_s28 = scalar_lea.hbm %s1386_s1, 128 }
  0x4d   : > { %p976_p5 = scmp.ne.s32.totalorder %s1229_s7, %s975_s30  ;;  %p981_p6 = scmp.lt.u32.totalorder %s1229_s7, %s1386_s1 }
  0x4e   : > { %p982_p8 = scmp.lt.u32.totalorder %s980_s28, %s975_s30  ;;  %p984_p13 = scmp.lt.u32.totalorder %s975_s30, %s1229_s7 }
  0x4f   : > { %p978_p1 = pnand %p976_p5, %p947_p0 }
  0x50   : > { %p983_p10 = por %p982_p8, %p981_p6 }
  0x51   : > { %p979_p4 = pneg %p978_p1 }
  0x52   : > { %p985_p3 = por %p984_p13, %p983_p10 }
  0x54   : > { %p986_p7 = pnand %p985_p3, %p979_p4 }
  0x56   : > { %989 = shalt.err (!%p986_p7)
}
  0x57   : > { %s990_s29 = scalar_lea.vmem %s182_s11, 64  ;;  %s1085_s22 = smov [#allocation7]  }
  0x58   : > { %p991_p9 = scmp.ne.s32.totalorder %s182_s11, %s990_s29  ;;  %s995_s26 = sshll.u32 %s1085_s22, 4  ;;  %s996_s26 = int_to_ptr.vmem [resolvable:$false] %s995_s26 }
  0x59   : > { %s997_s8 = scalar_lea.vmem %s996_s26, 128  ;;  %p998_p1 = scmp.lt.s32.totalorder %s182_s11, %s996_s26 }
  0x5a   : > { %p993_p2 = pnand %p991_p9, %p947_p0  ;;  %p999_p12 = scmp.lt.s32.totalorder %s997_s8, %s990_s29 }
  0x5c   : > { %p994_p5 = pneg %p993_p2  ;;  %p1000_p6 = por %p999_p12, %p998_p1 }
  0x5e   : > { %p1001_p8 = pnand %p1000_p6, %p994_p5 }
  0x60   : > { %1004 = shalt.err (!%p1001_p8)
}
  0x61   : > { %843 = dma.hbm_to_vmem [thread:$0]  (!%p1220_p11), %s1229_s7, 64, %s182_s11, %s171_s23  }
  0x62   : > { %p1400_p4 = scmp.ne.s32.totalorder %s1395_s20, 0 }
  0x63   : > { %s1280_s9 = sand.u32 (!%p1400_p4), 1, %s1071_s13   ;;  %p1401_p0 = scmp.ne.s32.totalorder (!%p1400_p4), %s1393_s18, 0 }
  0x64   : > { %190 = sbr.rel (%p1400_p4) target bundleno = 1266 (0x4f2), region = 32  ;;  %s769_s10 = sshll.u32 (!%p1400_p4), %s1280_s9, 2 }
  0x65   : > { %s193_s30 = scalar_lea.sflag (!%p1400_p4), [#allocation5], %s1280_s9  ;;  %s196_s25 = scalar_lea.vmem (!%p1400_p4), [#allocation4], %s769_s10 }
  0x6b   : > { %1050 = dma.done.wait (%p1401_p0), %s193_s30, 64  }
  0x6c   : > { %1052 = vsyncadd (%p1401_p0), %s193_s30, 4294967232  ;;  %s201_s4 = sand.u32 1, %s1136_s16   ;;  %s1289_s20 = scalar_lea.vmem [#allocation7], %s769_s10 }
  0x6d   : > { %s202_s7 = scalar_lea.sflag [#allocation8], %s201_s4 }
  0x6e   : > { %1054 = dma.done.wait (%p1401_p0), %s202_s7, 64  }
  0x6f   : > { %1056 = vsyncadd (%p1401_p0), %s202_s7, 4294967232  ;;  %p1402_p12 = scmp.eq.s32.totalorder %s1136_s16, 0 }
  0x71   : > { %1058 = dma.done.wait (%p1402_p12), [#allocation8], 128   ;;  %p1403_p11 = pmov %p1402_p12 }
  0x72   : > { %v1086_v0 = vmov 0.0   ;;  %vm1087_vm0 = vmmov 0   ;;  %v900_v1 = vld [vmem:[#allocation9] sm:$0xff]   ;;  %v238_v2 = vld [vmem:[%s196_s25] sm:$0xf]  ;;  %vm247_vm1 = vcmask 130048   ;;  %v300_v18 = vlaneseq }
  0x73   : > { %1060 = vsyncadd (%p1403_p11), [#allocation8], 4294967168  ;;  %793 = vmatprep.subr.bf16.mxu0 %v1086_v0  ;;  %795 = vmatprep.mubr.msk.bf16.mxu0 %vm1087_vm0, %v1086_v0  ;;  %v1088_v3 = vmov 0   ;;  %v1089_v4 = vmov 2   ;;  %vm292_vm2 = vcmask 257024   ;;  %s1090_s18 = smov 96  }
  0x74   : > { %799 = vmatprep.subr.bf16.mxu1 %v1086_v0  ;;  %801 = vmatprep.mubr.msk.bf16.mxu1 %vm1087_vm0, %v1086_v0  ;;  %vm369_vm3 = vcmask 1043456   ;;  %vm298_vm4 = vcmask 64512   ;;  %s1091_s11 = smov 124   ;;  %v1092_v14 = vmov 1   ;;  %v1093_v15 = vmov 3   ;;  %s772_s23 = sshll.u32 %s1280_s9, 3 }
  0x75   : > { %794 = vmatpush3.bf16.msra.mxu0 %v900_v1  ;;  %895 = vset.pattern.permute.xlu1 %v1088_v3  ;;  %v346_v20 = vshrl.u32 %v300_v18, 7  ;;  %v302_v32 = vld [vmem:[%s1289_s20] sm:$0xf]  ;;  %s780_s27 = sshll.u32 %s1136_s16, 7  ;;  %s236_s28 = scalar_lea.vmem [#allocation10], %s772_s23  ;;  %vm642_vm15 = vcmask 261120  }
  0x76   : > { %805 = vmatprep.subr.bf16.mxu0 %v1086_v0  ;;  %897 = vset.pattern.permute.xlu0 %v1089_v4  ;;  %v352_v37 = vunpack.c.l.bf16 %v302_v32  ;;  %s658_s5 = sshll.u32 %s236_s28, 4  ;;  %s1341_s22 = scalar_lea.hbm %s1388_s3, %s780_s27  ;;  %s1343_s5 = int_to_ptr.vmem [resolvable:$true] %s658_s5 }
  0x77   : > { %v347_v22 = vsub.s32 0, %v346_v20  ;;  %v426_v23 = vsub.s32 1, %v346_v20  ;;  %v500_v24 = vsub.s32 2, %v346_v20  ;;  %v574_v25 = vsub.s32 3, %v346_v20  ;;  %s645_s16 = scalar_lea.sflag [#allocation6], %s1280_s9  ;;  %s1005_s26 = scalar_lea.vmem %s1343_s5, 128 }
  0x78   : > { %796 = vmatmul.mubr.msk.bf16.vlgmr.msra.gmra.mrb[0].mxu0 %vm247_vm1, %v238_v2  ;;  %p1006_p10 = scmp.ne.s32.totalorder %s1343_s5, %s1005_s26  ;;  %p1404_p13 = scmp.ne.s32.totalorder %s1398_s21, 0 }
  0x79   : > { %807 = vmatprep.mubr.msk.bf16.mxu0 %vm1087_vm0, %v1086_v0  ;;  %s1094_s8 = smov [#allocation10]  }
  0x7a   : > { %p1007_p3 = pnand %p1006_p10, %p1404_p13  ;;  %s1009_s10 = sshll.u32 %s1094_s8, 4  ;;  %s1010_s10 = int_to_ptr.vmem [resolvable:$false] %s1009_s10 }
  0x7b   : > { %s1011_s30 = scalar_lea.vmem %s1010_s10, 256  ;;  %p1012_p9 = scmp.lt.s32.totalorder %s1343_s5, %s1010_s10 }
  0x7c   : > { %p1008_p7 = pneg %p1007_p3  ;;  %p1013_p2 = scmp.lt.s32.totalorder %s1011_s30, %s1005_s26 }
  0x7e   : > { %p1014_p5 = por %p1013_p2, %p1012_p9 }
  0x80   : > { %p1015_p1 = pnand %p1014_p5, %p1008_p7 }
 0x14b   : > { %v285_v5 = vpop.f32.mrb[0].mxu0 }
 0x14c   : > { %v291_v6 = vpack.c.bf16 %v285_v5, %v285_v5  ;;  %295 = vrot.lane.b32.xlu0 %v285_v5, %s1090_s18  ;;  %v797_v7 = vpop.f32.mrb[1].mxu0 }
 0x14d   : > { %v288_v8 = vpop.f32.mrb[2].mxu0 }
 0x14e   : > { %293 = vst.msk [vmem:[#allocation2] sm:$0xf] %vm292_vm2, %v291_v6  ;;  %v798_v9 = vpop.f32.mrb[3].mxu0 }
 0x155   : > { %v303_v10 = vld [vmem:[#allocation2] sm:$0xf] }
 0x156   : > { %v1308_v11 = vsel %vm369_vm3, %v303_v10, 0 }
 0x157   : > { %800 = vmatpush3.bf16.msra.mxu1 %v1308_v11  ;;  %806 = vmatpush3.bf16.msra.mxu0 %v1308_v11 }
 0x158   : > { %811 = vmatprep.subr.bf16.mxu1 %v1086_v0  ;;  %817 = vmatprep.subr.bf16.mxu0 %v1086_v0 }
 0x1be   : > { %v296_v12 = vpop.permute.xlu0 %295 }
 0x1bf   : > { %299 = vst.msk [vmem:[#allocation3] sm:$0xff] %vm298_vm4, %v296_v12 }
 0x1c6   : > { %v304_v13 = vld [vmem:[#allocation3] sm:$0xff] }
 0x1c7   : > { %342 = vperm.xlu1 %895, %v304_v13   ;;  %306 = vrot.lane.b32.xlu0 %v304_v13, %s1091_s11 }
 0x1cb   : > { %896 = vset.pattern.permute.xlu1 %v1092_v14  ;;  %495 = vperm.xlu0 %897, %v304_v13  }
 0x1cc   : > { %421 = vperm.xlu1 %896, %v304_v13  }
 0x1cf   : > { %899 = vset.pattern.permute.xlu0 %v1093_v15 }
 0x1d0   : > { %898 = vset.pattern.permute.xlu1 %v1093_v15 }
 0x1d1   : > { %569 = vperm.xlu1 %898, %v304_v13  }
 0x239   : > { %v307_v16 = vpop.permute.xlu0 %306 }
 0x23a   : > { %309 = vxpose.xlu1.b32.start.end [1/1] (short) (narrow) %v307_v16, 8 }
 0x246   : > { %v343_v17 = vpop.permute.xlu1 %342 }
 0x24a   : > { %v496_v31 = vpop.permute.xlu0 %495 }
 0x24b   : > { %v422_v19 = vpop.permute.xlu1 %421 }
 0x250   : > { %v570_v21 = vpop.permute.xlu1 %569 }
 0x2ba   : > { %v325_v26 = vpop.trf.xlu1 }
 0x2bb   : > { %v348_v27 = vrot.slane %v325_v26, %v347_v22  ;;  %v427_v28 = vrot.slane %v325_v26, %v426_v23  ;;  %v501_v29 = vrot.slane %v325_v26, %v500_v24  ;;  %v575_v30 = vrot.slane %v325_v26, %v574_v25 }
 0x2bd   : > { %v576_v33 = vadd.f32 %v575_v30, %v570_v21  ;;  %v349_v34 = vadd.f32 %v348_v27, %v343_v17  ;;  %v428_v35 = vadd.f32 %v427_v28, %v422_v19  ;;  %v502_v36 = vadd.f32 %v501_v29, %v496_v31 }
 0x2be   : > { %v301_v29 = vand.u32 127, %v300_v18 }
 0x2bf   : > { %v577_v38 = vmul.f32 0.2, %v576_v33  ;;  %v350_v39 = vmul.f32 0.2, %v349_v34  ;;  %v429_v40 = vmul.f32 0.2, %v428_v35 }
 0x2c0   : > { %v503_v44 = vmul.f32 0.2, %v502_v36  ;;  %vm414_vm5 = vcmp.lt.s32.totalorder %v301_v29, 8  ;;  %vm487_vm6 = vcmp.ge.s32.totalorder %v301_v29, 8  ;;  %vm488_vm7 = vcmp.lt.s32.totalorder %v301_v29, 16 }
 0x2c1   : > { %v578_v41 = vmax.f32 %v576_v33, %v577_v38  ;;  %v351_v42 = vmax.f32 %v349_v34, %v350_v39  ;;  %v430_v43 = vmax.f32 %v428_v35, %v429_v40  ;;  %vm489_vm8 = vmand %vm487_vm6, %vm488_vm7  ;;  %vm561_vm9 = vcmp.ge.s32.totalorder %v301_v29, 16 }
 0x2c2   : > { %v504_v50 = vmax.f32 %v502_v36, %v503_v44  ;;  %vm562_vm10 = vcmp.lt.s32.totalorder %v301_v29, 24  ;;  %vm635_vm12 = vcmp.ge.s32.totalorder %v301_v29, 24  ;;  %vm636_vm13 = vcmp.lt.s32.totalorder %v301_v29, 32 }
 0x2c3   : > { %v579_v45 = vadd.f32 %v578_v41, %v352_v37  ;;  %v353_v46 = vadd.f32 %v352_v37, %v351_v42  ;;  %v431_v49 = vadd.f32 %v430_v43, %v352_v37  ;;  %vm563_vm11 = vmand %vm561_vm9, %vm562_vm10 }
 0x2c4   : > { %v505_v52 = vadd.f32 %v504_v50, %v352_v37  ;;  %vm637_vm14 = vmand %vm635_vm12, %vm636_vm13 }
 0x2c5   : > { %v580_v47 = vsel %vm298_vm4, %v579_v45, -inf  ;;  %v354_v48 = vsel %vm298_vm4, %v353_v46, -inf  ;;  %v432_v51 = vsel %vm298_vm4, %v431_v49, -inf }
 0x2c6   : > { %581 = vmax.xlane.f32.xlu1 %v580_v47  ;;  %355 = vmax.xlane.f32.xlu0 %v354_v48  ;;  %v506_v53 = vsel %vm298_vm4, %v505_v52, -inf }
 0x2ca   : > { %433 = vmax.xlane.f32.xlu0 %v432_v51 }
 0x2ce   : > { %507 = vmax.xlane.f32.xlu0 %v506_v53 }
 0x353   : > { %v356_v54 = vpop.xlane.xlu0 %355  ;;  %v582_v58 = vpop.xlane.xlu1 %581 }
 0x354   : > { %v357_v55 = vsub.f32 %v353_v46, %v356_v54  ;;  %v583_v61 = vsub.f32 %v579_v45, %v582_v58 }
 0x356   : > { %v358_v56 = vmul.f32 1.442695, %v357_v55  ;;  %v584_v2 = vmul.f32 1.442695, %v583_v61 }
 0x357   : > { %v434_v57 = vpop.xlane.xlu0 %433 }
 0x358   : > { %v435_v59 = vsub.f32 %v431_v49, %v434_v57  ;;  %901 = vpow2.f32 %v358_v56 }
 0x35a   : > { %v436_v60 = vmul.f32 1.442695, %v435_v59 }
 0x35b   : > { %v508_v62 = vpop.xlane.xlu0 %507 }
 0x35c   : > { %903 = vpow2.f32 %v436_v60  ;;  %v509_v63 = vsub.f32 %v505_v52, %v508_v62 }
 0x35e   : > { %v510_v1 = vmul.f32 1.442695, %v509_v63 }
 0x360   : > { %905 = vpow2.f32 %v510_v1 }
 0x361   : > { %907 = vpow2.f32 %v584_v2 }
 0x362   : > { %v902_v3 = vpop.eup %901 }
 0x363   : > { %v360_v4 = vsel %vm298_vm4, %v902_v3, 0.0 }
 0x364   : > { %361 = vadd.xlane.f32.xlu0 %v360_v4 }
 0x366   : > { %v904_v5 = vpop.eup %903 }
 0x367   : > { %v438_v6 = vsel %vm298_vm4, %v904_v5, 0.0 }
 0x368   : > { %439 = vadd.xlane.f32.xlu0 %v438_v6 }
 0x36a   : > { %v906_v7 = vpop.eup %905 }
 0x36b   : > { %v512_v8 = vsel %vm298_vm4, %v906_v7, 0.0  ;;  %v908_v9 = vpop.eup %907 }
 0x36c   : > { %513 = vadd.xlane.f32.xlu0 %v512_v8  ;;  %v586_v10 = vsel %vm298_vm4, %v908_v9, 0.0 }
 0x370   : > { %587 = vadd.xlane.f32.xlu0 %v586_v10 }
 0x3f1   : > { %v362_v12 = vpop.xlane.xlu0 %361 }
 0x3f2   : > { %909 = vrcp.f32 %v362_v12 }
 0x3f5   : > { %v440_v13 = vpop.xlane.xlu0 %439 }
 0x3f6   : > { %911 = vrcp.f32 %v440_v13 }
 0x3f9   : > { %v514_v14 = vpop.xlane.xlu0 %513 }
 0x3fa   : > { %913 = vrcp.f32 %v514_v14 }
 0x3fc   : > { %v910_v15 = vpop.eup %909 }
 0x3fd   : > { %v588_v16 = vpop.xlane.xlu0 %587  ;;  %v364_v17 = vmul.f32 %v910_v15, %v902_v3 }
 0x3fe   : > { %915 = vrcp.f32 %v588_v16 }
 0x3ff   : > { %v365_v19 = vpack.c.bf16 %v364_v17, %v364_v17 }
 0x400   : > { %v912_v20 = vpop.eup %911 }
 0x401   : > { %v442_v21 = vmul.f32 %v912_v20, %v904_v5  ;;  %802 = vmatmul.mubr.msk.bf16.vlgmr.msra.gmra.mrb[0].mxu1 %vm298_vm4, %v365_v19 }
 0x402   : > { %812 = vmatpush3.bf16.msra.mxu1 %v1308_v11  ;;  %813 = vmatprep.mubr.msk.bf16.mxu1 %vm1087_vm0, %v1086_v0 }
 0x403   : > { %v443_v22 = vpack.c.bf16 %v442_v21, %v442_v21 }
 0x404   : > { %v914_v23 = vpop.eup %913 }
 0x405   : > { %v516_v24 = vmul.f32 %v914_v23, %v906_v7  ;;  %808 = vmatmul.mubr.msk.bf16.vlgmr.msra.gmra.mrb[4].mxu0 %vm298_vm4, %v443_v22 }
 0x406   : > { %818 = vmatpush3.bf16.msra.mxu0 %v1308_v11  ;;  %819 = vmatprep.mubr.msk.bf16.mxu0 %vm1087_vm0, %v1086_v0 }
 0x407   : > { %v517_v25 = vpack.c.bf16 %v516_v24, %v516_v24 }
 0x408   : > { %v916_v26 = vpop.eup %915 }
 0x409   : > { %v590_v27 = vmul.f32 %v916_v26, %v908_v9  ;;  %814 = vmatmul.mubr.msk.bf16.vlgmr.msra.gmra.mrb[4].mxu1 %vm298_vm4, %v517_v25 }
 0x40b   : > { %v591_v28 = vpack.c.bf16 %v590_v27, %v590_v27 }
 0x40d   : > { %820 = vmatmul.mubr.msk.bf16.vlgmr.msra.gmra.mrb[8].mxu0 %vm298_vm4, %v591_v28 }
 0x4d4   : > { %v407_v30 = vpop.f32.mrb[0].mxu1 }
 0x4d5   : > { %v418_v31 = vsel %vm414_vm5, %v407_v30, 0.0  ;;  %v803_v11 = vpop.f32.mrb[1].mxu1 }
 0x4d6   : > { %v410_v32 = vpop.f32.mrb[2].mxu1 }
 0x4d7   : > { %v804_v0 = vpop.f32.mrb[3].mxu1 }
 0x4d8   : > { %v481_v33 = vpop.f32.mrb[4].mxu0 }
 0x4d9   : > { %v492_v34 = vsel %vm489_vm8, %v481_v33, 0.0  ;;  %v809_v35 = vpop.f32.mrb[5].mxu0 }
 0x4da   : > { %v493_v36 = vadd.f32 %v492_v34, %v418_v31  ;;  %v484_v37 = vpop.f32.mrb[6].mxu0 }
 0x4db   : > { %v810_v18 = vpop.f32.mrb[7].mxu0 }
 0x4dc   : > { %v555_v38 = vpop.f32.mrb[4].mxu1 }
 0x4dd   : > { %v566_v39 = vsel %vm563_vm11, %v555_v38, 0.0  ;;  %v815_v40 = vpop.f32.mrb[5].mxu1 }
 0x4de   : > { %v567_v41 = vadd.f32 %v566_v39, %v493_v36  ;;  %v558_v42 = vpop.f32.mrb[6].mxu1 }
 0x4df   : > { %v816_v43 = vpop.f32.mrb[7].mxu1 }
 0x4e0   : > { %v629_v44 = vpop.f32.mrb[8].mxu0 }
 0x4e1   : > { %v640_v45 = vsel %vm637_vm14, %v629_v44, 0.0  ;;  %v821_v46 = vpop.f32.mrb[9].mxu0 }
 0x4e2   : > { %v641_v47 = vadd.f32 %v640_v45, %v567_v41  ;;  %v632_v48 = vpop.f32.mrb[10].mxu0 }
 0x4e3   : > { %v822_v49 = vpop.f32.mrb[11].mxu0 }
 0x4e4   : > { %643 = vst.msk [vmem:[%s236_s28] sm:$0xff] %vm642_vm15, %v641_v47 }
 0x4e5   : > { %1018 = shalt.err (!%p1015_p1)
}
 0x4e6   : > { %s1019_s9 = scalar_lea.hbm %s1341_s22, 128  ;;  %s1023_s7 = scalar_lea.hbm %s1388_s3, 256 }
 0x4e7   : > { %p1020_p6 = scmp.ne.s32.totalorder %s1341_s22, %s1019_s9  ;;  %p1024_p0 = scmp.lt.u32.totalorder %s1341_s22, %s1388_s3 }
 0x4e8   : > { %p1025_p12 = scmp.lt.u32.totalorder %s1023_s7, %s1019_s9  ;;  %p1027_p10 = scmp.lt.u32.totalorder %s1019_s9, %s1341_s22 }
 0x4e9   : > { %p1021_p8 = pnand %p1020_p6, %p1404_p13 }
 0x4ea   : > { %p1026_p11 = por %p1025_p12, %p1024_p0 }
 0x4eb   : > { %p1022_p4 = pneg %p1021_p8 }
 0x4ec   : > { %p1028_p3 = por %p1027_p10, %p1026_p11 }
 0x4ee   : > { %p1029_p7 = pnand %p1028_p3, %p1022_p4 }
 0x4f0   : > { %1032 = shalt.err (!%p1029_p7)
}
 0x4f1   : > { %831 = dma.vmem_to_hbm [thread:$0]  (%p1404_p13), %s1343_s5, 128, %s1341_s22, %s645_s16  }
 0x4f2 PF: > { %s670_s11 = sand.u32 1, %s1067_s12   ;;  %p1405_p9 = scmp.ne.s32.totalorder %s1394_s19, 0 }
 0x4f3   : > { %p1406_p2 = scmp.ge.s32.totalorder %s1079_s15, 2  ;;  %s671_s23 = scalar_lea.sflag [#allocation6], %s670_s11 }
 0x4f5   : > { %p845_p5 = pnand %p1406_p2, %p1405_p9 }
 0x4f7   : > { %1062 = dma.done.wait (!%p845_p5), %s671_s23, 128  }
 0x4f8   : > { %1064 = vsyncadd (!%p845_p5), %s671_s23, 4294967168  ;;  %p19_p1 = scmp.ge.s32.totalorder %s1171_s24, 4   ;;  %s1407_s12 = smov %s1071_s13 }
 0x4f9   : > { %s1408_s13 = smov %s1075_s14  ;;  %s1409_s14 = smov %s1202_s17 }
 0x4fa   : > { %s1410_s15 = smov %s1171_s24  ;;  %21 = sbr.rel (!%p19_p1) target bundleno = 7 (0x7), region = 94 }
 0x501   :  { %676 = vsyncpa [#allocation5], 1 }
 0x502   :  { %678 = vsyncpa [#allocation5 + $0x1], 1 }
 0x503   :  { %679 = vsyncpa [#allocation8], 1 }
 0x504   :  { %681 = vsyncpa [#allocation8 + $0x1], 1 }
 0x505   :  { %682 = vsyncpa [#allocation6], 1 }
 0x506   :  { %684 = vsyncpa [#allocation6 + $0x1], 1 }

</bundles_post_ra>
